<compile_context>
chip_gen: v6e
topology: v6e:2x2x1
jax: 0.10.0
libtpu: 0.0.40
codegen_flags: <defaults>
</compile_context>

<pallas_src>
import jax
import jax.numpy as jnp
from jax.experimental import pallas as pl
from jax.experimental.pallas import tpu as pltpu

LANE = 128


def corr2d_kernel(x_ref, w_ref, b_ref, y_ref, xs_ref):
    """Y = corr2d(X, K) + bias on lane-padded tiles.

    x_ref  : [H, Wo_pad + kw - 1]  VMEM (zero-padded on the right)
    w_ref  : [kh, kw]              SMEM (scalar taps)
    b_ref  : [Ho, Wo_pad]          VMEM (bias, zero-padded; aliased with y)
    y_ref  : [Ho, Wo_pad]          VMEM (lane-dense output slab)
    xs_ref : [H,  Wo_pad]          VMEM scratch holding the lane-shifted input
    """
    Ho, Wop = y_ref.shape
    kh, kw = w_ref.shape

    # Accumulator starts from the bias tile (saves a zeros init + an add).
    acc = b_ref[...]

    # One lane (column) shift per dj, materialized into VMEM scratch; the
    # kh row windows per dj are then plain ref loads (vld) at sublane offsets,
    # keeping the XLU free and letting the 4 VALU slots do the MACs.
    for dj in range(kw):
        xs_ref[...] = x_ref[:, dj:dj + Wop]
        for di in range(kh):
            acc = acc + xs_ref[di:di + Ho, :] * w_ref[di, dj]

    y_ref[...] = acc.astype(y_ref.dtype)


@jax.jit
def conv2d_forward(x, weight, bias):
    """Jitted Pallas wrapper reproducing Conv2d.forward: corr2d(x, weight) + bias."""
    H, W = x.shape
    kh, kw = weight.shape
    Ho, Wo = H - kh + 1, W - kw + 1

    # The PyTorch module only works when bias broadcasts against the corr2d
    # output without growing it; make that explicit (trace-time check).
    assert jnp.broadcast_shapes((Ho, Wo), bias.shape) == (Ho, Wo), (
        "bias shape must broadcast to the corr2d output shape")

    # Lane-dense output: round output width up to a multiple of 128; zero-pad
    # the input and bias accordingly and slice the real window out afterwards.
    Wo_pad = ((Wo + LANE - 1) // LANE) * LANE
    W_pad = Wo_pad + kw - 1

    x_pad = jnp.pad(x.astype(jnp.float32), ((0, 0), (0, W_pad - W)))
    b_pad = jnp.pad(
        jnp.broadcast_to(bias, (Ho, Wo)).astype(jnp.float32),
        ((0, 0), (0, Wo_pad - Wo)))

    y_pad = pl.pallas_call(
        corr2d_kernel,
        out_shape=jax.ShapeDtypeStruct((Ho, Wo_pad), jnp.float32),
        in_specs=[
            pl.BlockSpec(memory_space=pltpu.MemorySpace.VMEM),   # X (full array)
            pl.BlockSpec(memory_space=pltpu.MemorySpace.SMEM),   # weight scalars
            pl.BlockSpec(memory_space=pltpu.MemorySpace.VMEM),   # padded bias
        ],
        out_specs=pl.BlockSpec(memory_space=pltpu.MemorySpace.VMEM),
        scratch_shapes=[pltpu.VMEM((H, Wo_pad), jnp.float32)],   # shifted-input scratch
        input_output_aliases={2: 0},                             # bias buffer == output buffer
    )(x_pad, weight.astype(jnp.float32), b_pad)

    return y_pad[:, :Wo]


def conv2d_reference(x, weight, bias):
    """Pure-JAX reference of the PyTorch forward, for verification."""
    kh, kw = weight.shape
    Ho, Wo = x.shape[0] - kh + 1, x.shape[1] - kw + 1
    acc = jnp.zeros((Ho, Wo), jnp.float32)
    for di in range(kh):
        for dj in range(kw):
            acc = acc + x[di:di + Ho, dj:dj + Wo] * weight[di, dj]
    return acc + bias


if __name__ == "__main__":
    # Shapes chosen so the (output + bias) broadcast is valid, exactly as the
    # PyTorch module requires: kernel_size=(8, 8) and X of (15, 15) gives a
    # corr2d output of (8, 8), matching the bias shape.
    kernel_size = (8, 8)
    x_shape = (15, 15)

    key = jax.random.PRNGKey(0)
    k_x, k_w = jax.random.split(key)

    x = jax.random.normal(k_x, x_shape, dtype=jnp.float32)
    # torch.rand(kernel_size) -> uniform [0, 1)
    weight = jax.random.uniform(k_w, kernel_size, dtype=jnp.float32)
    # torch.zeros(kernel_size)
    bias = jnp.zeros(kernel_size, dtype=jnp.float32)

    out = jax.block_until_ready(conv2d_forward(x, weight, bias))

    ref = conv2d_reference(x, weight, bias)
    assert out.shape == ref.shape
    assert jnp.allclose(out, ref, atol=1e-5, rtol=1e-5)

    print("KERNEL_OK")
</pallas_src>

<mosaic_0001>
module attributes {stable_mosaic.version = 11 : i64} {
  func.func @corr2d_kernel(%arg0: memref<15x135xf32, #tpu.memory_space<vmem>>, %arg1: memref<8x8xf32, #tpu.memory_space<smem>>, %arg2: memref<8x128xf32, #tpu.memory_space<vmem>>, %arg3: memref<8x128xf32, #tpu.memory_space<vmem>>, %arg4: memref<15x128xf32, #tpu.memory_space<vmem>>) attributes {dimension_semantics = [], scalar_prefetch = 0 : i64, scratch_operands = 1 : i64, tpu.core_type = #tpu.core_type<tc>} {
    %c0 = arith.constant 0 : index
    %c0_0 = arith.constant 0 : index
    %0 = vector.load %arg2[%c0, %c0_0] : memref<8x128xf32, #tpu.memory_space<vmem>>, vector<8x128xf32>
    %c0_1 = arith.constant 0 : index
    %c0_2 = arith.constant 0 : index
    %1 = vector.load %arg0[%c0_1, %c0_2] : memref<15x135xf32, #tpu.memory_space<vmem>>, vector<15x128xf32>
    %c0_3 = arith.constant 0 : index
    %c0_4 = arith.constant 0 : index
    %2 = vector.load %arg4[%c0_3, %c0_4] : memref<15x128xf32, #tpu.memory_space<vmem>>, vector<15x128xf32>
    tpu.vector_store %arg4[%c0_3, %c0_4], %1 {strides = array<i32>} : memref<15x128xf32, #tpu.memory_space<vmem>>, vector<15x128xf32>,
    %c0_5 = arith.constant 0 : index
    %c0_6 = arith.constant 0 : index
    %3 = vector.load %arg4[%c0_5, %c0_6] : memref<15x128xf32, #tpu.memory_space<vmem>>, vector<8x128xf32>
    %c0_7 = arith.constant 0 : index
    %c0_8 = arith.constant 0 : index
    %4 = memref.load %arg1[%c0_7, %c0_8] : memref<8x8xf32, #tpu.memory_space<smem>>
    %5 = vector.broadcast %4 : f32 to vector<8x128xf32>
    %6 = arith.mulf %3, %5 : vector<8x128xf32>
    %7 = arith.addf %0, %6 : vector<8x128xf32>
    %c1 = arith.constant 1 : index
    %c0_9 = arith.constant 0 : index
    %8 = vector.load %arg4[%c1, %c0_9] : memref<15x128xf32, #tpu.memory_space<vmem>>, vector<8x128xf32>
    %c1_10 = arith.constant 1 : index
    %c0_11 = arith.constant 0 : index
    %9 = memref.load %arg1[%c1_10, %c0_11] : memref<8x8xf32, #tpu.memory_space<smem>>
    %10 = vector.broadcast %9 : f32 to vector<8x128xf32>
    %11 = arith.mulf %8, %10 : vector<8x128xf32>
    %12 = arith.addf %7, %11 : vector<8x128xf32>
    %c2 = arith.constant 2 : index
    %c0_12 = arith.constant 0 : index
    %13 = vector.load %arg4[%c2, %c0_12] : memref<15x128xf32, #tpu.memory_space<vmem>>, vector<8x128xf32>
    %c2_13 = arith.constant 2 : index
    %c0_14 = arith.constant 0 : index
    %14 = memref.load %arg1[%c2_13, %c0_14] : memref<8x8xf32, #tpu.memory_space<smem>>
    %15 = vector.broadcast %14 : f32 to vector<8x128xf32>
    %16 = arith.mulf %13, %15 : vector<8x128xf32>
    %17 = arith.addf %12, %16 : vector<8x128xf32>
    %c3 = arith.constant 3 : index
    %c0_15 = arith.constant 0 : index
    %18 = vector.load %arg4[%c3, %c0_15] : memref<15x128xf32, #tpu.memory_space<vmem>>, vector<8x128xf32>
    %c3_16 = arith.constant 3 : index
    %c0_17 = arith.constant 0 : index
    %19 = memref.load %arg1[%c3_16, %c0_17] : memref<8x8xf32, #tpu.memory_space<smem>>
    %20 = vector.broadcast %19 : f32 to vector<8x128xf32>
    %21 = arith.mulf %18, %20 : vector<8x128xf32>
    %22 = arith.addf %17, %21 : vector<8x128xf32>
    %c4 = arith.constant 4 : index
    %c0_18 = arith.constant 0 : index
    %23 = vector.load %arg4[%c4, %c0_18] : memref<15x128xf32, #tpu.memory_space<vmem>>, vector<8x128xf32>
    %c4_19 = arith.constant 4 : index
    %c0_20 = arith.constant 0 : index
    %24 = memref.load %arg1[%c4_19, %c0_20] : memref<8x8xf32, #tpu.memory_space<smem>>
    %25 = vector.broadcast %24 : f32 to vector<8x128xf32>
    %26 = arith.mulf %23, %25 : vector<8x128xf32>
    %27 = arith.addf %22, %26 : vector<8x128xf32>
    %c5 = arith.constant 5 : index
    %c0_21 = arith.constant 0 : index
    %28 = vector.load %arg4[%c5, %c0_21] : memref<15x128xf32, #tpu.memory_space<vmem>>, vector<8x128xf32>
    %c5_22 = arith.constant 5 : index
    %c0_23 = arith.constant 0 : index
    %29 = memref.load %arg1[%c5_22, %c0_23] : memref<8x8xf32, #tpu.memory_space<smem>>
    %30 = vector.broadcast %29 : f32 to vector<8x128xf32>
    %31 = arith.mulf %28, %30 : vector<8x128xf32>
    %32 = arith.addf %27, %31 : vector<8x128xf32>
    %c6 = arith.constant 6 : index
    %c0_24 = arith.constant 0 : index
    %33 = vector.load %arg4[%c6, %c0_24] : memref<15x128xf32, #tpu.memory_space<vmem>>, vector<8x128xf32>
    %c6_25 = arith.constant 6 : index
    %c0_26 = arith.constant 0 : index
    %34 = memref.load %arg1[%c6_25, %c0_26] : memref<8x8xf32, #tpu.memory_space<smem>>
    %35 = vector.broadcast %34 : f32 to vector<8x128xf32>
    %36 = arith.mulf %33, %35 : vector<8x128xf32>
    %37 = arith.addf %32, %36 : vector<8x128xf32>
    %c7 = arith.constant 7 : index
    %c0_27 = arith.constant 0 : index
    %38 = vector.load %arg4[%c7, %c0_27] : memref<15x128xf32, #tpu.memory_space<vmem>>, vector<8x128xf32>
    %c7_28 = arith.constant 7 : index
    %c0_29 = arith.constant 0 : index
    %39 = memref.load %arg1[%c7_28, %c0_29] : memref<8x8xf32, #tpu.memory_space<smem>>
    %40 = vector.broadcast %39 : f32 to vector<8x128xf32>
    %41 = arith.mulf %38, %40 : vector<8x128xf32>
    %42 = arith.addf %37, %41 : vector<8x128xf32>
    %c0_30 = arith.constant 0 : index
    %c1_31 = arith.constant 1 : index
    %43 = vector.load %arg0[%c0_30, %c1_31] : memref<15x135xf32, #tpu.memory_space<vmem>>, vector<15x128xf32>
    %c0_32 = arith.constant 0 : index
    %c0_33 = arith.constant 0 : index
    %44 = vector.load %arg4[%c0_32, %c0_33] : memref<15x128xf32, #tpu.memory_space<vmem>>, vector<15x128xf32>
    tpu.vector_store %arg4[%c0_32, %c0_33], %43 {strides = array<i32>} : memref<15x128xf32, #tpu.memory_space<vmem>>, vector<15x128xf32>,
    %c0_34 = arith.constant 0 : index
    %c0_35 = arith.constant 0 : index
    %45 = vector.load %arg4[%c0_34, %c0_35] : memref<15x128xf32, #tpu.memory_space<vmem>>, vector<8x128xf32>
    %c0_36 = arith.constant 0 : index
    %c1_37 = arith.constant 1 : index
    %46 = memref.load %arg1[%c0_36, %c1_37] : memref<8x8xf32, #tpu.memory_space<smem>>
    %47 = vector.broadcast %46 : f32 to vector<8x128xf32>
    %48 = arith.mulf %45, %47 : vector<8x128xf32>
    %49 = arith.addf %42, %48 : vector<8x128xf32>
    %c1_38 = arith.constant 1 : index
    %c0_39 = arith.constant 0 : index
    %50 = vector.load %arg4[%c1_38, %c0_39] : memref<15x128xf32, #tpu.memory_space<vmem>>, vector<8x128xf32>
    %c1_40 = arith.constant 1 : index
    %c1_41 = arith.constant 1 : index
    %51 = memref.load %arg1[%c1_40, %c1_41] : memref<8x8xf32, #tpu.memory_space<smem>>
    %52 = vector.broadcast %51 : f32 to vector<8x128xf32>
    %53 = arith.mulf %50, %52 : vector<8x128xf32>
    %54 = arith.addf %49, %53 : vector<8x128xf32>
    %c2_42 = arith.constant 2 : index
    %c0_43 = arith.constant 0 : index
    %55 = vector.load %arg4[%c2_42, %c0_43] : memref<15x128xf32, #tpu.memory_space<vmem>>, vector<8x128xf32>
    %c2_44 = arith.constant 2 : index
    %c1_45 = arith.constant 1 : index
    %56 = memref.load %arg1[%c2_44, %c1_45] : memref<8x8xf32, #tpu.memory_space<smem>>
    %57 = vector.broadcast %56 : f32 to vector<8x128xf32>
    %58 = arith.mulf %55, %57 : vector<8x128xf32>
    %59 = arith.addf %54, %58 : vector<8x128xf32>
    %c3_46 = arith.constant 3 : index
    %c0_47 = arith.constant 0 : index
    %60 = vector.load %arg4[%c3_46, %c0_47] : memref<15x128xf32, #tpu.memory_space<vmem>>, vector<8x128xf32>
    %c3_48 = arith.constant 3 : index
    %c1_49 = arith.constant 1 : index
    %61 = memref.load %arg1[%c3_48, %c1_49] : memref<8x8xf32, #tpu.memory_space<smem>>
    %62 = vector.broadcast %61 : f32 to vector<8x128xf32>
    %63 = arith.mulf %60, %62 : vector<8x128xf32>
    %64 = arith.addf %59, %63 : vector<8x128xf32>
    %c4_50 = arith.constant 4 : index
    %c0_51 = arith.constant 0 : index
    %65 = vector.load %arg4[%c4_50, %c0_51] : memref<15x128xf32, #tpu.memory_space<vmem>>, vector<8x128xf32>
    %c4_52 = arith.constant 4 : index
    %c1_53 = arith.constant 1 : index
    %66 = memref.load %arg1[%c4_52, %c1_53] : memref<8x8xf32, #tpu.memory_space<smem>>
    %67 = vector.broadcast %66 : f32 to vector<8x128xf32>
    %68 = arith.mulf %65, %67 : vector<8x128xf32>
    %69 = arith.addf %64, %68 : vector<8x128xf32>
    %c5_54 = arith.constant 5 : index
    %c0_55 = arith.constant 0 : index
    %70 = vector.load %arg4[%c5_54, %c0_55] : memref<15x128xf32, #tpu.memory_space<vmem>>, vector<8x128xf32>
    %c5_56 = arith.constant 5 : index
    %c1_57 = arith.constant 1 : index
    %71 = memref.load %arg1[%c5_56, %c1_57] : memref<8x8xf32, #tpu.memory_space<smem>>
    %72 = vector.broadcast %71 : f32 to vector<8x128xf32>
    %73 = arith.mulf %70, %72 : vector<8x128xf32>
    %74 = arith.addf %69, %73 : vector<8x128xf32>
    %c6_58 = arith.constant 6 : index
    %c0_59 = arith.constant 0 : index
    %75 = vector.load %arg4[%c6_58, %c0_59] : memref<15x128xf32, #tpu.memory_space<vmem>>, vector<8x128xf32>
    %c6_60 = arith.constant 6 : index
    %c1_61 = arith.constant 1 : index
    %76 = memref.load %arg1[%c6_60, %c1_61] : memref<8x8xf32, #tpu.memory_space<smem>>
    %77 = vector.broadcast %76 : f32 to vector<8x128xf32>
    %78 = arith.mulf %75, %77 : vector<8x128xf32>
    %79 = arith.addf %74, %78 : vector<8x128xf32>
    %c7_62 = arith.constant 7 : index
    %c0_63 = arith.constant 0 : index
    %80 = vector.load %arg4[%c7_62, %c0_63] : memref<15x128xf32, #tpu.memory_space<vmem>>, vector<8x128xf32>
    %c7_64 = arith.constant 7 : index
    %c1_65 = arith.constant 1 : index
    %81 = memref.load %arg1[%c7_64, %c1_65] : memref<8x8xf32, #tpu.memory_space<smem>>
    %82 = vector.broadcast %81 : f32 to vector<8x128xf32>
    %83 = arith.mulf %80, %82 : vector<8x128xf32>
    %84 = arith.addf %79, %83 : vector<8x128xf32>
    %c0_66 = arith.constant 0 : index
    %c2_67 = arith.constant 2 : index
    %85 = vector.load %arg0[%c0_66, %c2_67] : memref<15x135xf32, #tpu.memory_space<vmem>>, vector<15x128xf32>
    %c0_68 = arith.constant 0 : index
    %c0_69 = arith.constant 0 : index
    %86 = vector.load %arg4[%c0_68, %c0_69] : memref<15x128xf32, #tpu.memory_space<vmem>>, vector<15x128xf32>
    tpu.vector_store %arg4[%c0_68, %c0_69], %85 {strides = array<i32>} : memref<15x128xf32, #tpu.memory_space<vmem>>, vector<15x128xf32>,
    %c0_70 = arith.constant 0 : index
    %c0_71 = arith.constant 0 : index
    %87 = vector.load %arg4[%c0_70, %c0_71] : memref<15x128xf32, #tpu.memory_space<vmem>>, vector<8x128xf32>
    %c0_72 = arith.constant 0 : index
    %c2_73 = arith.constant 2 : index
    %88 = memref.load %arg1[%c0_72, %c2_73] : memref<8x8xf32, #tpu.memory_space<smem>>
    %89 = vector.broadcast %88 : f32 to vector<8x128xf32>
    %90 = arith.mulf %87, %89 : vector<8x128xf32>
    %91 = arith.addf %84, %90 : vector<8x128xf32>
    %c1_74 = arith.constant 1 : index
    %c0_75 = arith.constant 0 : index
    %92 = vector.load %arg4[%c1_74, %c0_75] : memref<15x128xf32, #tpu.memory_space<vmem>>, vector<8x128xf32>
    %c1_76 = arith.constant 1 : index
    %c2_77 = arith.constant 2 : index
    %93 = memref.load %arg1[%c1_76, %c2_77] : memref<8x8xf32, #tpu.memory_space<smem>>
    %94 = vector.broadcast %93 : f32 to vector<8x128xf32>
    %95 = arith.mulf %92, %94 : vector<8x128xf32>
    %96 = arith.addf %91, %95 : vector<8x128xf32>
    %c2_78 = arith.constant 2 : index
    %c0_79 = arith.constant 0 : index
    %97 = vector.load %arg4[%c2_78, %c0_79] : memref<15x128xf32, #tpu.memory_space<vmem>>, vector<8x128xf32>
    %c2_80 = arith.constant 2 : index
    %c2_81 = arith.constant 2 : index
    %98 = memref.load %arg1[%c2_80, %c2_81] : memref<8x8xf32, #tpu.memory_space<smem>>
    %99 = vector.broadcast %98 : f32 to vector<8x128xf32>
    %100 = arith.mulf %97, %99 : vector<8x128xf32>
    %101 = arith.addf %96, %100 : vector<8x128xf32>
    %c3_82 = arith.constant 3 : index
    %c0_83 = arith.constant 0 : index
    %102 = vector.load %arg4[%c3_82, %c0_83] : memref<15x128xf32, #tpu.memory_space<vmem>>, vector<8x128xf32>
    %c3_84 = arith.constant 3 : index
    %c2_85 = arith.constant 2 : index
    %103 = memref.load %arg1[%c3_84, %c2_85] : memref<8x8xf32, #tpu.memory_space<smem>>
    %104 = vector.broadcast %103 : f32 to vector<8x128xf32>
    %105 = arith.mulf %102, %104 : vector<8x128xf32>
    %106 = arith.addf %101, %105 : vector<8x128xf32>
    %c4_86 = arith.constant 4 : index
    %c0_87 = arith.constant 0 : index
    %107 = vector.load %arg4[%c4_86, %c0_87] : memref<15x128xf32, #tpu.memory_space<vmem>>, vector<8x128xf32>
    %c4_88 = arith.constant 4 : index
    %c2_89 = arith.constant 2 : index
    %108 = memref.load %arg1[%c4_88, %c2_89] : memref<8x8xf32, #tpu.memory_space<smem>>
    %109 = vector.broadcast %108 : f32 to vector<8x128xf32>
    %110 = arith.mulf %107, %109 : vector<8x128xf32>
    %111 = arith.addf %106, %110 : vector<8x128xf32>
    %c5_90 = arith.constant 5 : index
    %c0_91 = arith.constant 0 : index
    %112 = vector.load %arg4[%c5_90, %c0_91] : memref<15x128xf32, #tpu.memory_space<vmem>>, vector<8x128xf32>
    %c5_92 = arith.constant 5 : index
    %c2_93 = arith.constant 2 : index
    %113 = memref.load %arg1[%c5_92, %c2_93] : memref<8x8xf32, #tpu.memory_space<smem>>
    %114 = vector.broadcast %113 : f32 to vector<8x128xf32>
    %115 = arith.mulf %112, %114 : vector<8x128xf32>
    %116 = arith.addf %111, %115 : vector<8x128xf32>
    %c6_94 = arith.constant 6 : index
    %c0_95 = arith.constant 0 : index
    %117 = vector.load %arg4[%c6_94, %c0_95] : memref<15x128xf32, #tpu.memory_space<vmem>>, vector<8x128xf32>
    %c6_96 = arith.constant 6 : index
    %c2_97 = arith.constant 2 : index
    %118 = memref.load %arg1[%c6_96, %c2_97] : memref<8x8xf32, #tpu.memory_space<smem>>
    %119 = vector.broadcast %118 : f32 to vector<8x128xf32>
    %120 = arith.mulf %117, %119 : vector<8x128xf32>
    %121 = arith.addf %116, %120 : vector<8x128xf32>
    %c7_98 = arith.constant 7 : index
    %c0_99 = arith.constant 0 : index
    %122 = vector.load %arg4[%c7_98, %c0_99] : memref<15x128xf32, #tpu.memory_space<vmem>>, vector<8x128xf32>
    %c7_100 = arith.constant 7 : index
    %c2_101 = arith.constant 2 : index
    %123 = memref.load %arg1[%c7_100, %c2_101] : memref<8x8xf32, #tpu.memory_space<smem>>
    %124 = vector.broadcast %123 : f32 to vector<8x128xf32>
    %125 = arith.mulf %122, %124 : vector<8x128xf32>
    %126 = arith.addf %121, %125 : vector<8x128xf32>
    %c0_102 = arith.constant 0 : index
    %c3_103 = arith.constant 3 : index
    %127 = vector.load %arg0[%c0_102, %c3_103] : memref<15x135xf32, #tpu.memory_space<vmem>>, vector<15x128xf32>
    %c0_104 = arith.constant 0 : index
    %c0_105 = arith.constant 0 : index
    %128 = vector.load %arg4[%c0_104, %c0_105] : memref<15x128xf32, #tpu.memory_space<vmem>>, vector<15x128xf32>
    tpu.vector_store %arg4[%c0_104, %c0_105], %127 {strides = array<i32>} : memref<15x128xf32, #tpu.memory_space<vmem>>, vector<15x128xf32>,
    %c0_106 = arith.constant 0 : index
    %c0_107 = arith.constant 0 : index
    %129 = vector.load %arg4[%c0_106, %c0_107] : memref<15x128xf32, #tpu.memory_space<vmem>>, vector<8x128xf32>
    %c0_108 = arith.constant 0 : index
    %c3_109 = arith.constant 3 : index
    %130 = memref.load %arg1[%c0_108, %c3_109] : memref<8x8xf32, #tpu.memory_space<smem>>
    %131 = vector.broadcast %130 : f32 to vector<8x128xf32>
    %132 = arith.mulf %129, %131 : vector<8x128xf32>
    %133 = arith.addf %126, %132 : vector<8x128xf32>
    %c1_110 = arith.constant 1 : index
    %c0_111 = arith.constant 0 : index
    %134 = vector.load %arg4[%c1_110, %c0_111] : memref<15x128xf32, #tpu.memory_space<vmem>>, vector<8x128xf32>
    %c1_112 = arith.constant 1 : index
    %c3_113 = arith.constant 3 : index
    %135 = memref.load %arg1[%c1_112, %c3_113] : memref<8x8xf32, #tpu.memory_space<smem>>
    %136 = vector.broadcast %135 : f32 to vector<8x128xf32>
    %137 = arith.mulf %134, %136 : vector<8x128xf32>
    %138 = arith.addf %133, %137 : vector<8x128xf32>
    %c2_114 = arith.constant 2 : index
    %c0_115 = arith.constant 0 : index
    %139 = vector.load %arg4[%c2_114, %c0_115] : memref<15x128xf32, #tpu.memory_space<vmem>>, vector<8x128xf32>
    %c2_116 = arith.constant 2 : index
    %c3_117 = arith.constant 3 : index
    %140 = memref.load %arg1[%c2_116, %c3_117] : memref<8x8xf32, #tpu.memory_space<smem>>
    %141 = vector.broadcast %140 : f32 to vector<8x128xf32>
    %142 = arith.mulf %139, %141 : vector<8x128xf32>
    %143 = arith.addf %138, %142 : vector<8x128xf32>
    %c3_118 = arith.constant 3 : index
    %c0_119 = arith.constant 0 : index
    %144 = vector.load %arg4[%c3_118, %c0_119] : memref<15x128xf32, #tpu.memory_space<vmem>>, vector<8x128xf32>
    %c3_120 = arith.constant 3 : index
    %c3_121 = arith.constant 3 : index
    %145 = memref.load %arg1[%c3_120, %c3_121] : memref<8x8xf32, #tpu.memory_space<smem>>
    %146 = vector.broadcast %145 : f32 to vector<8x128xf32>
    %147 = arith.mulf %144, %146 : vector<8x128xf32>
    %148 = arith.addf %143, %147 : vector<8x128xf32>
    %c4_122 = arith.constant 4 : index
    %c0_123 = arith.constant 0 : index
    %149 = vector.load %arg4[%c4_122, %c0_123] : memref<15x128xf32, #tpu.memory_space<vmem>>, vector<8x128xf32>
    %c4_124 = arith.constant 4 : index
    %c3_125 = arith.constant 3 : index
    %150 = memref.load %arg1[%c4_124, %c3_125] : memref<8x8xf32, #tpu.memory_space<smem>>
    %151 = vector.broadcast %150 : f32 to vector<8x128xf32>
    %152 = arith.mulf %149, %151 : vector<8x128xf32>
    %153 = arith.addf %148, %152 : vector<8x128xf32>
    %c5_126 = arith.constant 5 : index
    %c0_127 = arith.constant 0 : index
    %154 = vector.load %arg4[%c5_126, %c0_127] : memref<15x128xf32, #tpu.memory_space<vmem>>, vector<8x128xf32>
    %c5_128 = arith.constant 5 : index
    %c3_129 = arith.constant 3 : index
    %155 = memref.load %arg1[%c5_128, %c3_129] : memref<8x8xf32, #tpu.memory_space<smem>>
    %156 = vector.broadcast %155 : f32 to vector<8x128xf32>
    %157 = arith.mulf %154, %156 : vector<8x128xf32>
    %158 = arith.addf %153, %157 : vector<8x128xf32>
    %c6_130 = arith.constant 6 : index
    %c0_131 = arith.constant 0 : index
    %159 = vector.load %arg4[%c6_130, %c0_131] : memref<15x128xf32, #tpu.memory_space<vmem>>, vector<8x128xf32>
    %c6_132 = arith.constant 6 : index
    %c3_133 = arith.constant 3 : index
    %160 = memref.load %arg1[%c6_132, %c3_133] : memref<8x8xf32, #tpu.memory_space<smem>>
    %161 = vector.broadcast %160 : f32 to vector<8x128xf32>
    %162 = arith.mulf %159, %161 : vector<8x128xf32>
    %163 = arith.addf %158, %162 : vector<8x128xf32>
    %c7_134 = arith.constant 7 : index
    %c0_135 = arith.constant 0 : index
    %164 = vector.load %arg4[%c7_134, %c0_135] : memref<15x128xf32, #tpu.memory_space<vmem>>, vector<8x128xf32>
    %c7_136 = arith.constant 7 : index
    %c3_137 = arith.constant 3 : index
    %165 = memref.load %arg1[%c7_136, %c3_137] : memref<8x8xf32, #tpu.memory_space<smem>>
    %166 = vector.broadcast %165 : f32 to vector<8x128xf32>
    %167 = arith.mulf %164, %166 : vector<8x128xf32>
    %168 = arith.addf %163, %167 : vector<8x128xf32>
    %c0_138 = arith.constant 0 : index
    %c4_139 = arith.constant 4 : index
    %169 = vector.load %arg0[%c0_138, %c4_139] : memref<15x135xf32, #tpu.memory_space<vmem>>, vector<15x128xf32>
    %c0_140 = arith.constant 0 : index
    %c0_141 = arith.constant 0 : index
    %170 = vector.load %arg4[%c0_140, %c0_141] : memref<15x128xf32, #tpu.memory_space<vmem>>, vector<15x128xf32>
    tpu.vector_store %arg4[%c0_140, %c0_141], %169 {strides = array<i32>} : memref<15x128xf32, #tpu.memory_space<vmem>>, vector<15x128xf32>,
    %c0_142 = arith.constant 0 : index
    %c0_143 = arith.constant 0 : index
    %171 = vector.load %arg4[%c0_142, %c0_143] : memref<15x128xf32, #tpu.memory_space<vmem>>, vector<8x128xf32>
    %c0_144 = arith.constant 0 : index
    %c4_145 = arith.constant 4 : index
    %172 = memref.load %arg1[%c0_144, %c4_145] : memref<8x8xf32, #tpu.memory_space<smem>>
    %173 = vector.broadcast %172 : f32 to vector<8x128xf32>
    %174 = arith.mulf %171, %173 : vector<8x128xf32>
    %175 = arith.addf %168, %174 : vector<8x128xf32>
    %c1_146 = arith.constant 1 : index
    %c0_147 = arith.constant 0 : index
    %176 = vector.load %arg4[%c1_146, %c0_147] : memref<15x128xf32, #tpu.memory_space<vmem>>, vector<8x128xf32>
    %c1_148 = arith.constant 1 : index
    %c4_149 = arith.constant 4 : index
    %177 = memref.load %arg1[%c1_148, %c4_149] : memref<8x8xf32, #tpu.memory_space<smem>>
    %178 = vector.broadcast %177 : f32 to vector<8x128xf32>
    %179 = arith.mulf %176, %178 : vector<8x128xf32>
    %180 = arith.addf %175, %179 : vector<8x128xf32>
    %c2_150 = arith.constant 2 : index
    %c0_151 = arith.constant 0 : index
    %181 = vector.load %arg4[%c2_150, %c0_151] : memref<15x128xf32, #tpu.memory_space<vmem>>, vector<8x128xf32>
    %c2_152 = arith.constant 2 : index
    %c4_153 = arith.constant 4 : index
    %182 = memref.load %arg1[%c2_152, %c4_153] : memref<8x8xf32, #tpu.memory_space<smem>>
    %183 = vector.broadcast %182 : f32 to vector<8x128xf32>
    %184 = arith.mulf %181, %183 : vector<8x128xf32>
    %185 = arith.addf %180, %184 : vector<8x128xf32>
    %c3_154 = arith.constant 3 : index
    %c0_155 = arith.constant 0 : index
    %186 = vector.load %arg4[%c3_154, %c0_155] : memref<15x128xf32, #tpu.memory_space<vmem>>, vector<8x128xf32>
    %c3_156 = arith.constant 3 : index
    %c4_157 = arith.constant 4 : index
    %187 = memref.load %arg1[%c3_156, %c4_157] : memref<8x8xf32, #tpu.memory_space<smem>>
    %188 = vector.broadcast %187 : f32 to vector<8x128xf32>
    %189 = arith.mulf %186, %188 : vector<8x128xf32>
    %190 = arith.addf %185, %189 : vector<8x128xf32>
    %c4_158 = arith.constant 4 : index
    %c0_159 = arith.constant 0 : index
    %191 = vector.load %arg4[%c4_158, %c0_159] : memref<15x128xf32, #tpu.memory_space<vmem>>, vector<8x128xf32>
    %c4_160 = arith.constant 4 : index
    %c4_161 = arith.constant 4 : index
    %192 = memref.load %arg1[%c4_160, %c4_161] : memref<8x8xf32, #tpu.memory_space<smem>>
    %193 = vector.broadcast %192 : f32 to vector<8x128xf32>
    %194 = arith.mulf %191, %193 : vector<8x128xf32>
    %195 = arith.addf %190, %194 : vector<8x128xf32>
    %c5_162 = arith.constant 5 : index
    %c0_163 = arith.constant 0 : index
    %196 = vector.load %arg4[%c5_162, %c0_163] : memref<15x128xf32, #tpu.memory_space<vmem>>, vector<8x128xf32>
    %c5_164 = arith.constant 5 : index
    %c4_165 = arith.constant 4 : index
    %197 = memref.load %arg1[%c5_164, %c4_165] : memref<8x8xf32, #tpu.memory_space<smem>>
    %198 = vector.broadcast %197 : f32 to vector<8x128xf32>
    %199 = arith.mulf %196, %198 : vector<8x128xf32>
    %200 = arith.addf %195, %199 : vector<8x128xf32>
    %c6_166 = arith.constant 6 : index
    %c0_167 = arith.constant 0 : index
    %201 = vector.load %arg4[%c6_166, %c0_167] : memref<15x128xf32, #tpu.memory_space<vmem>>, vector<8x128xf32>
    %c6_168 = arith.constant 6 : index
    %c4_169 = arith.constant 4 : index
    %202 = memref.load %arg1[%c6_168, %c4_169] : memref<8x8xf32, #tpu.memory_space<smem>>
    %203 = vector.broadcast %202 : f32 to vector<8x128xf32>
    %204 = arith.mulf %201, %203 : vector<8x128xf32>
    %205 = arith.addf %200, %204 : vector<8x128xf32>
    %c7_170 = arith.constant 7 : index
    %c0_171 = arith.constant 0 : index
    %206 = vector.load %arg4[%c7_170, %c0_171] : memref<15x128xf32, #tpu.memory_space<vmem>>, vector<8x128xf32>
    %c7_172 = arith.constant 7 : index
    %c4_173 = arith.constant 4 : index
    %207 = memref.load %arg1[%c7_172, %c4_173] : memref<8x8xf32, #tpu.memory_space<smem>>
    %208 = vector.broadcast %207 : f32 to vector<8x128xf32>
    %209 = arith.mulf %206, %208 : vector<8x128xf32>
    %210 = arith.addf %205, %209 : vector<8x128xf32>
    %c0_174 = arith.constant 0 : index
    %c5_175 = arith.constant 5 : index
    %211 = vector.load %arg0[%c0_174, %c5_175] : memref<15x135xf32, #tpu.memory_space<vmem>>, vector<15x128xf32>
    %c0_176 = arith.constant 0 : index
    %c0_177 = arith.constant 0 : index
    %212 = vector.load %arg4[%c0_176, %c0_177] : memref<15x128xf32, #tpu.memory_space<vmem>>, vector<15x128xf32>
    tpu.vector_store %arg4[%c0_176, %c0_177], %211 {strides = array<i32>} : memref<15x128xf32, #tpu.memory_space<vmem>>, vector<15x128xf32>,
    %c0_178 = arith.constant 0 : index
    %c0_179 = arith.constant 0 : index
    %213 = vector.load %arg4[%c0_178, %c0_179] : memref<15x128xf32, #tpu.memory_space<vmem>>, vector<8x128xf32>
    %c0_180 = arith.constant 0 : index
    %c5_181 = arith.constant 5 : index
    %214 = memref.load %arg1[%c0_180, %c5_181] : memref<8x8xf32, #tpu.memory_space<smem>>
    %215 = vector.broadcast %214 : f32 to vector<8x128xf32>
    %216 = arith.mulf %213, %215 : vector<8x128xf32>
    %217 = arith.addf %210, %216 : vector<8x128xf32>
    %c1_182 = arith.constant 1 : index
    %c0_183 = arith.constant 0 : index
    %218 = vector.load %arg4[%c1_182, %c0_183] : memref<15x128xf32, #tpu.memory_space<vmem>>, vector<8x128xf32>
    %c1_184 = arith.constant 1 : index
    %c5_185 = arith.constant 5 : index
    %219 = memref.load %arg1[%c1_184, %c5_185] : memref<8x8xf32, #tpu.memory_space<smem>>
    %220 = vector.broadcast %219 : f32 to vector<8x128xf32>
    %221 = arith.mulf %218, %220 : vector<8x128xf32>
    %222 = arith.addf %217, %221 : vector<8x128xf32>
    %c2_186 = arith.constant 2 : index
    %c0_187 = arith.constant 0 : index
    %223 = vector.load %arg4[%c2_186, %c0_187] : memref<15x128xf32, #tpu.memory_space<vmem>>, vector<8x128xf32>
    %c2_188 = arith.constant 2 : index
    %c5_189 = arith.constant 5 : index
    %224 = memref.load %arg1[%c2_188, %c5_189] : memref<8x8xf32, #tpu.memory_space<smem>>
    %225 = vector.broadcast %224 : f32 to vector<8x128xf32>
    %226 = arith.mulf %223, %225 : vector<8x128xf32>
    %227 = arith.addf %222, %226 : vector<8x128xf32>
    %c3_190 = arith.constant 3 : index
    %c0_191 = arith.constant 0 : index
    %228 = vector.load %arg4[%c3_190, %c0_191] : memref<15x128xf32, #tpu.memory_space<vmem>>, vector<8x128xf32>
    %c3_192 = arith.constant 3 : index
    %c5_193 = arith.constant 5 : index
    %229 = memref.load %arg1[%c3_192, %c5_193] : memref<8x8xf32, #tpu.memory_space<smem>>
    %230 = vector.broadcast %229 : f32 to vector<8x128xf32>
    %231 = arith.mulf %228, %230 : vector<8x128xf32>
    %232 = arith.addf %227, %231 : vector<8x128xf32>
    %c4_194 = arith.constant 4 : index
    %c0_195 = arith.constant 0 : index
    %233 = vector.load %arg4[%c4_194, %c0_195] : memref<15x128xf32, #tpu.memory_space<vmem>>, vector<8x128xf32>
    %c4_196 = arith.constant 4 : index
    %c5_197 = arith.constant 5 : index
    %234 = memref.load %arg1[%c4_196, %c5_197] : memref<8x8xf32, #tpu.memory_space<smem>>
    %235 = vector.broadcast %234 : f32 to vector<8x128xf32>
    %236 = arith.mulf %233, %235 : vector<8x128xf32>
    %237 = arith.addf %232, %236 : vector<8x128xf32>
    %c5_198 = arith.constant 5 : index
    %c0_199 = arith.constant 0 : index
    %238 = vector.load %arg4[%c5_198, %c0_199] : memref<15x128xf32, #tpu.memory_space<vmem>>, vector<8x128xf32>
    %c5_200 = arith.constant 5 : index
    %c5_201 = arith.constant 5 : index
    %239 = memref.load %arg1[%c5_200, %c5_201] : memref<8x8xf32, #tpu.memory_space<smem>>
    %240 = vector.broadcast %239 : f32 to vector<8x128xf32>
    %241 = arith.mulf %238, %240 : vector<8x128xf32>
    %242 = arith.addf %237, %241 : vector<8x128xf32>
    %c6_202 = arith.constant 6 : index
    %c0_203 = arith.constant 0 : index
    %243 = vector.load %arg4[%c6_202, %c0_203] : memref<15x128xf32, #tpu.memory_space<vmem>>, vector<8x128xf32>
    %c6_204 = arith.constant 6 : index
    %c5_205 = arith.constant 5 : index
    %244 = memref.load %arg1[%c6_204, %c5_205] : memref<8x8xf32, #tpu.memory_space<smem>>
    %245 = vector.broadcast %244 : f32 to vector<8x128xf32>
    %246 = arith.mulf %243, %245 : vector<8x128xf32>
    %247 = arith.addf %242, %246 : vector<8x128xf32>
    %c7_206 = arith.constant 7 : index
    %c0_207 = arith.constant 0 : index
    %248 = vector.load %arg4[%c7_206, %c0_207] : memref<15x128xf32, #tpu.memory_space<vmem>>, vector<8x128xf32>
    %c7_208 = arith.constant 7 : index
    %c5_209 = arith.constant 5 : index
    %249 = memref.load %arg1[%c7_208, %c5_209] : memref<8x8xf32, #tpu.memory_space<smem>>
    %250 = vector.broadcast %249 : f32 to vector<8x128xf32>
    %251 = arith.mulf %248, %250 : vector<8x128xf32>
    %252 = arith.addf %247, %251 : vector<8x128xf32>
    %c0_210 = arith.constant 0 : index
    %c6_211 = arith.constant 6 : index
    %253 = vector.load %arg0[%c0_210, %c6_211] : memref<15x135xf32, #tpu.memory_space<vmem>>, vector<15x128xf32>
    %c0_212 = arith.constant 0 : index
    %c0_213 = arith.constant 0 : index
    %254 = vector.load %arg4[%c0_212, %c0_213] : memref<15x128xf32, #tpu.memory_space<vmem>>, vector<15x128xf32>
    tpu.vector_store %arg4[%c0_212, %c0_213], %253 {strides = array<i32>} : memref<15x128xf32, #tpu.memory_space<vmem>>, vector<15x128xf32>,
    %c0_214 = arith.constant 0 : index
    %c0_215 = arith.constant 0 : index
    %255 = vector.load %arg4[%c0_214, %c0_215] : memref<15x128xf32, #tpu.memory_space<vmem>>, vector<8x128xf32>
    %c0_216 = arith.constant 0 : index
    %c6_217 = arith.constant 6 : index
    %256 = memref.load %arg1[%c0_216, %c6_217] : memref<8x8xf32, #tpu.memory_space<smem>>
    %257 = vector.broadcast %256 : f32 to vector<8x128xf32>
    %258 = arith.mulf %255, %257 : vector<8x128xf32>
    %259 = arith.addf %252, %258 : vector<8x128xf32>
    %c1_218 = arith.constant 1 : index
    %c0_219 = arith.constant 0 : index
    %260 = vector.load %arg4[%c1_218, %c0_219] : memref<15x128xf32, #tpu.memory_space<vmem>>, vector<8x128xf32>
    %c1_220 = arith.constant 1 : index
    %c6_221 = arith.constant 6 : index
    %261 = memref.load %arg1[%c1_220, %c6_221] : memref<8x8xf32, #tpu.memory_space<smem>>
    %262 = vector.broadcast %261 : f32 to vector<8x128xf32>
    %263 = arith.mulf %260, %262 : vector<8x128xf32>
    %264 = arith.addf %259, %263 : vector<8x128xf32>
    %c2_222 = arith.constant 2 : index
    %c0_223 = arith.constant 0 : index
    %265 = vector.load %arg4[%c2_222, %c0_223] : memref<15x128xf32, #tpu.memory_space<vmem>>, vector<8x128xf32>
    %c2_224 = arith.constant 2 : index
    %c6_225 = arith.constant 6 : index
    %266 = memref.load %arg1[%c2_224, %c6_225] : memref<8x8xf32, #tpu.memory_space<smem>>
    %267 = vector.broadcast %266 : f32 to vector<8x128xf32>
    %268 = arith.mulf %265, %267 : vector<8x128xf32>
    %269 = arith.addf %264, %268 : vector<8x128xf32>
    %c3_226 = arith.constant 3 : index
    %c0_227 = arith.constant 0 : index
    %270 = vector.load %arg4[%c3_226, %c0_227] : memref<15x128xf32, #tpu.memory_space<vmem>>, vector<8x128xf32>
    %c3_228 = arith.constant 3 : index
    %c6_229 = arith.constant 6 : index
    %271 = memref.load %arg1[%c3_228, %c6_229] : memref<8x8xf32, #tpu.memory_space<smem>>
    %272 = vector.broadcast %271 : f32 to vector<8x128xf32>
    %273 = arith.mulf %270, %272 : vector<8x128xf32>
    %274 = arith.addf %269, %273 : vector<8x128xf32>
    %c4_230 = arith.constant 4 : index
    %c0_231 = arith.constant 0 : index
    %275 = vector.load %arg4[%c4_230, %c0_231] : memref<15x128xf32, #tpu.memory_space<vmem>>, vector<8x128xf32>
    %c4_232 = arith.constant 4 : index
    %c6_233 = arith.constant 6 : index
    %276 = memref.load %arg1[%c4_232, %c6_233] : memref<8x8xf32, #tpu.memory_space<smem>>
    %277 = vector.broadcast %276 : f32 to vector<8x128xf32>
    %278 = arith.mulf %275, %277 : vector<8x128xf32>
    %279 = arith.addf %274, %278 : vector<8x128xf32>
    %c5_234 = arith.constant 5 : index
    %c0_235 = arith.constant 0 : index
    %280 = vector.load %arg4[%c5_234, %c0_235] : memref<15x128xf32, #tpu.memory_space<vmem>>, vector<8x128xf32>
    %c5_236 = arith.constant 5 : index
    %c6_237 = arith.constant 6 : index
    %281 = memref.load %arg1[%c5_236, %c6_237] : memref<8x8xf32, #tpu.memory_space<smem>>
    %282 = vector.broadcast %281 : f32 to vector<8x128xf32>
    %283 = arith.mulf %280, %282 : vector<8x128xf32>
    %284 = arith.addf %279, %283 : vector<8x128xf32>
    %c6_238 = arith.constant 6 : index
    %c0_239 = arith.constant 0 : index
    %285 = vector.load %arg4[%c6_238, %c0_239] : memref<15x128xf32, #tpu.memory_space<vmem>>, vector<8x128xf32>
    %c6_240 = arith.constant 6 : index
    %c6_241 = arith.constant 6 : index
    %286 = memref.load %arg1[%c6_240, %c6_241] : memref<8x8xf32, #tpu.memory_space<smem>>
    %287 = vector.broadcast %286 : f32 to vector<8x128xf32>
    %288 = arith.mulf %285, %287 : vector<8x128xf32>
    %289 = arith.addf %284, %288 : vector<8x128xf32>
    %c7_242 = arith.constant 7 : index
    %c0_243 = arith.constant 0 : index
    %290 = vector.load %arg4[%c7_242, %c0_243] : memref<15x128xf32, #tpu.memory_space<vmem>>, vector<8x128xf32>
    %c7_244 = arith.constant 7 : index
    %c6_245 = arith.constant 6 : index
    %291 = memref.load %arg1[%c7_244, %c6_245] : memref<8x8xf32, #tpu.memory_space<smem>>
    %292 = vector.broadcast %291 : f32 to vector<8x128xf32>
    %293 = arith.mulf %290, %292 : vector<8x128xf32>
    %294 = arith.addf %289, %293 : vector<8x128xf32>
    %c0_246 = arith.constant 0 : index
    %c7_247 = arith.constant 7 : index
    %295 = vector.load %arg0[%c0_246, %c7_247] : memref<15x135xf32, #tpu.memory_space<vmem>>, vector<15x128xf32>
    %c0_248 = arith.constant 0 : index
    %c0_249 = arith.constant 0 : index
    %296 = vector.load %arg4[%c0_248, %c0_249] : memref<15x128xf32, #tpu.memory_space<vmem>>, vector<15x128xf32>
    tpu.vector_store %arg4[%c0_248, %c0_249], %295 {strides = array<i32>} : memref<15x128xf32, #tpu.memory_space<vmem>>, vector<15x128xf32>,
    %c0_250 = arith.constant 0 : index
    %c0_251 = arith.constant 0 : index
    %297 = vector.load %arg4[%c0_250, %c0_251] : memref<15x128xf32, #tpu.memory_space<vmem>>, vector<8x128xf32>
    %c0_252 = arith.constant 0 : index
    %c7_253 = arith.constant 7 : index
    %298 = memref.load %arg1[%c0_252, %c7_253] : memref<8x8xf32, #tpu.memory_space<smem>>
    %299 = vector.broadcast %298 : f32 to vector<8x128xf32>
    %300 = arith.mulf %297, %299 : vector<8x128xf32>
    %301 = arith.addf %294, %300 : vector<8x128xf32>
    %c1_254 = arith.constant 1 : index
    %c0_255 = arith.constant 0 : index
    %302 = vector.load %arg4[%c1_254, %c0_255] : memref<15x128xf32, #tpu.memory_space<vmem>>, vector<8x128xf32>
    %c1_256 = arith.constant 1 : index
    %c7_257 = arith.constant 7 : index
    %303 = memref.load %arg1[%c1_256, %c7_257] : memref<8x8xf32, #tpu.memory_space<smem>>
    %304 = vector.broadcast %303 : f32 to vector<8x128xf32>
    %305 = arith.mulf %302, %304 : vector<8x128xf32>
    %306 = arith.addf %301, %305 : vector<8x128xf32>
    %c2_258 = arith.constant 2 : index
    %c0_259 = arith.constant 0 : index
    %307 = vector.load %arg4[%c2_258, %c0_259] : memref<15x128xf32, #tpu.memory_space<vmem>>, vector<8x128xf32>
    %c2_260 = arith.constant 2 : index
    %c7_261 = arith.constant 7 : index
    %308 = memref.load %arg1[%c2_260, %c7_261] : memref<8x8xf32, #tpu.memory_space<smem>>
    %309 = vector.broadcast %308 : f32 to vector<8x128xf32>
    %310 = arith.mulf %307, %309 : vector<8x128xf32>
    %311 = arith.addf %306, %310 : vector<8x128xf32>
    %c3_262 = arith.constant 3 : index
    %c0_263 = arith.constant 0 : index
    %312 = vector.load %arg4[%c3_262, %c0_263] : memref<15x128xf32, #tpu.memory_space<vmem>>, vector<8x128xf32>
    %c3_264 = arith.constant 3 : index
    %c7_265 = arith.constant 7 : index
    %313 = memref.load %arg1[%c3_264, %c7_265] : memref<8x8xf32, #tpu.memory_space<smem>>
    %314 = vector.broadcast %313 : f32 to vector<8x128xf32>
    %315 = arith.mulf %312, %314 : vector<8x128xf32>
    %316 = arith.addf %311, %315 : vector<8x128xf32>
    %c4_266 = arith.constant 4 : index
    %c0_267 = arith.constant 0 : index
    %317 = vector.load %arg4[%c4_266, %c0_267] : memref<15x128xf32, #tpu.memory_space<vmem>>, vector<8x128xf32>
    %c4_268 = arith.constant 4 : index
    %c7_269 = arith.constant 7 : index
    %318 = memref.load %arg1[%c4_268, %c7_269] : memref<8x8xf32, #tpu.memory_space<smem>>
    %319 = vector.broadcast %318 : f32 to vector<8x128xf32>
    %320 = arith.mulf %317, %319 : vector<8x128xf32>
    %321 = arith.addf %316, %320 : vector<8x128xf32>
    %c5_270 = arith.constant 5 : index
    %c0_271 = arith.constant 0 : index
    %322 = vector.load %arg4[%c5_270, %c0_271] : memref<15x128xf32, #tpu.memory_space<vmem>>, vector<8x128xf32>
    %c5_272 = arith.constant 5 : index
    %c7_273 = arith.constant 7 : index
    %323 = memref.load %arg1[%c5_272, %c7_273] : memref<8x8xf32, #tpu.memory_space<smem>>
    %324 = vector.broadcast %323 : f32 to vector<8x128xf32>
    %325 = arith.mulf %322, %324 : vector<8x128xf32>
    %326 = arith.addf %321, %325 : vector<8x128xf32>
    %c6_274 = arith.constant 6 : index
    %c0_275 = arith.constant 0 : index
    %327 = vector.load %arg4[%c6_274, %c0_275] : memref<15x128xf32, #tpu.memory_space<vmem>>, vector<8x128xf32>
    %c6_276 = arith.constant 6 : index
    %c7_277 = arith.constant 7 : index
    %328 = memref.load %arg1[%c6_276, %c7_277] : memref<8x8xf32, #tpu.memory_space<smem>>
    %329 = vector.broadcast %328 : f32 to vector<8x128xf32>
    %330 = arith.mulf %327, %329 : vector<8x128xf32>
    %331 = arith.addf %326, %330 : vector<8x128xf32>
    %c7_278 = arith.constant 7 : index
    %c0_279 = arith.constant 0 : index
    %332 = vector.load %arg4[%c7_278, %c0_279] : memref<15x128xf32, #tpu.memory_space<vmem>>, vector<8x128xf32>
    %c7_280 = arith.constant 7 : index
    %c7_281 = arith.constant 7 : index
    %333 = memref.load %arg1[%c7_280, %c7_281] : memref<8x8xf32, #tpu.memory_space<smem>>
    %334 = vector.broadcast %333 : f32 to vector<8x128xf32>
    %335 = arith.mulf %332, %334 : vector<8x128xf32>
    %336 = arith.addf %331, %335 : vector<8x128xf32>
    %c0_282 = arith.constant 0 : index
    %c0_283 = arith.constant 0 : index
    %337 = vector.load %arg3[%c0_282, %c0_283] : memref<8x128xf32, #tpu.memory_space<vmem>>, vector<8x128xf32>
    tpu.vector_store %arg3[%c0_282, %c0_283], %336 {strides = array<i32>} : memref<8x128xf32, #tpu.memory_space<vmem>>, vector<8x128xf32>,
    return
  }
}

</mosaic_0001>

<bundles_post_ra>
// kernel: conv2d_forward.1
= control target key start
LH: loop header
LB: loop body
LE: loop exit
PB: predicated region body
PF: predicated region fallthrough
CT: control target
= control target key end

     0   :  { %8 = vsyncpa [#allocation4], 0  ;;  %s874_s0 = inlined_call_operand.vmem [shape: f32[15,135], index: 0, kind: input, shape index: {}]   ;;  %s875_s1 = inlined_call_operand.vmem [shape: f32[8,8], index: 1, kind: input, shape index: {}]   ;;  %s876_s2 = inlined_call_operand.vmem [shape: f32[8,128], index: 2, kind: input, shape index: {}, may-alias: {2,3}]   ;;  %s877_s3 = inlined_call_operand.vmem [shape: f32[8,128], index: 3, kind: output, shape index: {}, may-alias: {2,3}]  }
   0x1   :  { %s17_s14 = sshll.u32 %s875_s1, 4  ;;  %s18_s14 = int_to_ptr.vmem [resolvable:$true] %s17_s14 }
   0x2   :  { %s590_s15 = scalar_lea.vmem %s18_s14, 128  ;;  %p595_p1 = scmp.lt.s32.totalorder %s18_s14, %s18_s14 }
   0x3   :  { %p591_p0 = scmp.ne.s32.totalorder %s18_s14, %s590_s15  ;;  %p596_p2 = scmp.lt.s32.totalorder %s590_s15, %s590_s15 }
   0x5   :  { %p597_p3 = por %p596_p2, %p595_p1 }
   0x7   :  { %p598_p4 = pnand %p597_p3, %p591_p0 }
   0x9   :  { %601 = shalt.err (!%p598_p4)
}
   0xa   :  { %s604_s16 = smov [#allocation3]  }
   0xb   :  { %20 = dma.vmem_to_smem %s18_s14, 128, %s604_s16, [#allocation4]  }
   0xc   :  { %602 = dma.done.wait [#allocation4], 128  }
   0xd   :  { %603 = vsyncadd [#allocation4], 4294967168 }
   0xe   :  { %26 = sfence }
   0xf   :  { %v74_v0 = vld [vmem:[%s874_s0 + $0x10] sm:$0x7f]  ;;  %v72_v1 = vld [vmem:[%s874_s0] sm:$0xff]  ;;  %s605_s1 = smov 127   ;;  %v75_v2 = vld [vmem:[%s874_s0 + $0x18] sm:$0x7f] }
  0x10   :  { %84 = vrot.lane.b32.xlu1 %v74_v0, %s605_s1  ;;  %80 = vrot.lane.b32.xlu0 %v72_v1, %s605_s1  ;;  %30 = vst [vmem:[#allocation2] sm:$0xff] %v72_v1  ;;  %v73_v3 = vld [vmem:[%s874_s0 + $0x8] sm:$0xff]  ;;  %v29_v4 = vld [vmem:[%s874_s0 + $0x10] sm:$0x7f]  ;;  %s606_s27 = smov 126   ;;  %s607_s5 = smov 125  }
  0x11   :  { %31 = vst [vmem:[#allocation2 + $0x8] sm:$0x7f] %v29_v4  ;;  %v138_v5 = vld [vmem:[%s874_s0 + $0x18] sm:$0x7f]  ;;  %v137_v6 = vld [vmem:[%s874_s0 + $0x10] sm:$0x7f] }
  0x12   :  { %v201_v7 = vld [vmem:[%s874_s0 + $0x18] sm:$0x7f]  ;;  %v200_v8 = vld [vmem:[%s874_s0 + $0x10] sm:$0x7f]  ;;  %s608_s10 = smov 124   ;;  %s609_s15 = smov 123  }
  0x13   :  { %v264_v9 = vld [vmem:[%s874_s0 + $0x18] sm:$0x7f]  ;;  %v263_v10 = vld [vmem:[%s874_s0 + $0x10] sm:$0x7f]  ;;  %s610_s20 = smov 122   ;;  %s611_s24 = smov 121  }
  0x14   :  { %86 = vrot.lane.b32.xlu1 %v75_v2, %s605_s1  ;;  %82 = vrot.lane.b32.xlu0 %v73_v3, %s605_s1  ;;  %v327_v11 = vld [vmem:[%s874_s0 + $0x18] sm:$0x7f]  ;;  %v326_v12 = vld [vmem:[%s874_s0 + $0x10] sm:$0x7f]  ;;  %s33_s29 = sld [smem:[#allocation3]]  ;;  %vm88_vm0 = vcmask 1039360  }
  0x15   :  { %v390_v13 = vld [vmem:[%s874_s0 + $0x18] sm:$0x7f]  ;;  %v389_v14 = vld [vmem:[%s874_s0 + $0x10] sm:$0x7f]  ;;  %s519_s30 = sld [smem:[#allocation3 + $0x80]]  ;;  %v27_v20 = vld [vmem:[%s876_s2] sm:$0xff] }
  0x16   :  { %v453_v15 = vld [vmem:[%s874_s0 + $0x18] sm:$0x7f]  ;;  %v452_v16 = vld [vmem:[%s874_s0 + $0x10] sm:$0x7f]  ;;  %s520_s4 = sld [smem:[#allocation3 + $0x100]]  ;;  %vm151_vm1 = vcmask 1031168  }
  0x17   :  { %s521_s7 = sld [smem:[#allocation3 + $0x180]]  ;;  %vm214_vm2 = vcmask 1022976   ;;  %vm277_vm3 = vcmask 1014784   ;;  %vm340_vm4 = vcmask 1006592   ;;  %vm403_vm5 = vcmask 998400  }
  0x18   :  { %145 = vrot.lane.b32.xlu1 %v73_v3, %s606_s27  ;;  %143 = vrot.lane.b32.xlu0 %v72_v1, %s606_s27  ;;  %v37_v19 = vld [vmem:[#allocation2 + $0x1] sm:$0xff]  ;;  %s522_s8 = sld [smem:[#allocation3 + $0x200]]  ;;  %vm466_vm6 = vcmask 990208  }
  0x19   :  { %v42_v24 = vld [vmem:[#allocation2 + $0x2] sm:$0xff]  ;;  %s523_s0 = sld [smem:[#allocation3 + $0x280]] }
  0x1a   :  { %v34_v17 = vstv %s33_s29  ;;  %v47_v28 = vld [vmem:[#allocation2 + $0x3] sm:$0xff]  ;;  %s524_s9 = sld [smem:[#allocation3 + $0x300]] }
  0x1b   :  { %v35_v18 = vmul.f32 %v72_v1, %v34_v17  ;;  %v39_v21 = vstv %s519_s30  ;;  %v52_v32 = vld [vmem:[#allocation2 + $0x4] sm:$0xff]  ;;  %s525_s2 = sld [smem:[#allocation3 + $0x380]] }
  0x1c   :  { %149 = vrot.lane.b32.xlu1 %v138_v5, %s606_s27  ;;  %147 = vrot.lane.b32.xlu0 %v137_v6, %s606_s27  ;;  %v40_v23 = vmul.f32 %v39_v21, %v37_v19  ;;  %v44_v25 = vstv %s520_s4  ;;  %v57_v36 = vld [vmem:[#allocation2 + $0x5] sm:$0xff]  ;;  %s527_s11 = sld [smem:[#allocation3 + $0x81]] }
  0x1d   :  { %v36_v22 = vadd.f32 %v35_v18, %v27_v20  ;;  %v45_v27 = vmul.f32 %v44_v25, %v42_v24  ;;  %v49_v29 = vstv %s521_s7  ;;  %v62_v40 = vld [vmem:[#allocation2 + $0x6] sm:$0xff]  ;;  %s689_s12 = sld [smem:[#allocation3 + $0x101]] }
  0x1e   :  { %v50_v31 = vmul.f32 %v49_v29, %v47_v28  ;;  %v54_v33 = vstv %s522_s8  ;;  %v67_v46 = vld [vmem:[#allocation2 + $0x7] sm:$0xff]  ;;  %s691_s13 = sld [smem:[#allocation3 + $0x181]] }
  0x1f   :  { %v41_v26 = vadd.f32 %v40_v23, %v36_v22  ;;  %v55_v35 = vmul.f32 %v54_v33, %v52_v32  ;;  %v59_v37 = vstv %s523_s0  ;;  %s693_s14 = sld [smem:[#allocation3 + $0x201]] }
  0x20   :  { %208 = vrot.lane.b32.xlu1 %v73_v3, %s607_s5  ;;  %206 = vrot.lane.b32.xlu0 %v72_v1, %s607_s5  ;;  %v60_v39 = vmul.f32 %v59_v37, %v57_v36  ;;  %v64_v41 = vstv %s524_s9  ;;  %s698_s16 = sld [smem:[#allocation3 + $0x301]] }
  0x21   :  { %v46_v30 = vadd.f32 %v45_v27, %v41_v26  ;;  %v65_v45 = vmul.f32 %v64_v41, %v62_v40  ;;  %v69_v47 = vstv %s525_s2  ;;  %s701_s17 = sld [smem:[#allocation3 + $0x381]] }
  0x22   :  { %v70_v53 = vmul.f32 %v69_v47, %v67_v46  ;;  %v102_v59 = vstv %s527_s11  ;;  %s704_s18 = sld [smem:[#allocation3 + $0x2]] }
  0x23   :  { %v51_v34 = vadd.f32 %v50_v31, %v46_v30  ;;  %v107_v62 = vstv %s689_s12  ;;  %s707_s19 = sld [smem:[#allocation3 + $0x82]] }
  0x24   :  { %212 = vrot.lane.b32.xlu1 %v201_v7, %s607_s5  ;;  %210 = vrot.lane.b32.xlu0 %v200_v8, %s607_s5  ;;  %v112_v7 = vstv %s691_s13  ;;  %s713_s1 = sld [smem:[#allocation3 + $0x182]] }
  0x25   :  { %v56_v38 = vadd.f32 %v55_v35, %v51_v34  ;;  %s718_s21 = sld [smem:[#allocation3 + $0x202]] }
  0x26   :  { %v127_v23 = vstv %s698_s16  ;;  %s722_s22 = sld [smem:[#allocation3 + $0x282]] }
  0x27   :  { %v61_v44 = vadd.f32 %v60_v39, %v56_v38  ;;  %v132_v26 = vstv %s701_s17  ;;  %s725_s23 = sld [smem:[#allocation3 + $0x302]] }
  0x28   :  { %271 = vrot.lane.b32.xlu1 %v73_v3, %s608_s10  ;;  %269 = vrot.lane.b32.xlu0 %v72_v1, %s608_s10  ;;  %v160_v37 = vstv %s704_s18  ;;  %s731_s25 = sld [smem:[#allocation3 + $0x3]] }
  0x29   :  { %v66_v52 = vadd.f32 %v65_v45, %v61_v44  ;;  %s736_s26 = sld [smem:[#allocation3 + $0x83]] }
  0x2a   :  { %s746_s27 = sld [smem:[#allocation3 + $0x103]] }
  0x2b   :  { %v71_v57 = vadd.f32 %v70_v53, %v66_v52  ;;  %s749_s28 = sld [smem:[#allocation3 + $0x183]] }
  0x2c   :  { %275 = vrot.lane.b32.xlu1 %v264_v9, %s608_s10  ;;  %273 = vrot.lane.b32.xlu0 %v263_v10, %s608_s10  ;;  %s526_s10 = sld [smem:[#allocation3 + $0x1]] }
  0x2d   :  { %s752_s29 = sld [smem:[#allocation3 + $0x203]] }
  0x2e   :  { %s755_s30 = sld [smem:[#allocation3 + $0x283]] }
  0x2f   :  { %s769_s4 = sld [smem:[#allocation3 + $0x303]] }
  0x30   :  { %334 = vrot.lane.b32.xlu1 %v73_v3, %s609_s15  ;;  %332 = vrot.lane.b32.xlu0 %v72_v1, %s609_s15  ;;  %s779_s5 = sld [smem:[#allocation3 + $0x383]] }
  0x31   :  { %s782_s6 = sld [smem:[#allocation3 + $0x4]] }
  0x32   :  { %v97_v54 = vstv %s526_s10  ;;  %s785_s7 = sld [smem:[#allocation3 + $0x84]] }
  0x33   :  { %s788_s8 = sld [smem:[#allocation3 + $0x104]] }
  0x34   :  { %338 = vrot.lane.b32.xlu1 %v327_v11, %s609_s15  ;;  %336 = vrot.lane.b32.xlu0 %v326_v12, %s609_s15  ;;  %s695_s15 = sld [smem:[#allocation3 + $0x281]] }
  0x35   :  { %s802_s0 = sld [smem:[#allocation3 + $0x184]] }
  0x36   :  { %s813_s9 = sld [smem:[#allocation3 + $0x204]] }
  0x37   :  { %s817_s2 = sld [smem:[#allocation3 + $0x284]] }
  0x38   :  { %397 = vrot.lane.b32.xlu1 %v73_v3, %s610_s20  ;;  %395 = vrot.lane.b32.xlu0 %v72_v1, %s610_s20  ;;  %s821_s10 = sld [smem:[#allocation3 + $0x304]] }
  0x39   :  { %s825_s11 = sld [smem:[#allocation3 + $0x384]] }
  0x3a   :  { %v122_v18 = vstv %s695_s15  ;;  %s558_s12 = sld [smem:[#allocation3 + $0x5]] }
  0x3b   :  { %s559_s13 = sld [smem:[#allocation3 + $0x85]] }
  0x3c   :  { %401 = vrot.lane.b32.xlu1 %v390_v13, %s610_s20  ;;  %399 = vrot.lane.b32.xlu0 %v389_v14, %s610_s20  ;;  %s710_s20 = sld [smem:[#allocation3 + $0x102]] }
  0x3d   :  { %s561_s15 = sld [smem:[#allocation3 + $0x185]] }
  0x3e   :  { %s562_s16 = sld [smem:[#allocation3 + $0x205]] }
  0x3f   :  { %s563_s17 = sld [smem:[#allocation3 + $0x285]] }
  0x40   :  { %460 = vrot.lane.b32.xlu1 %v73_v3, %s611_s24  ;;  %458 = vrot.lane.b32.xlu0 %v72_v1, %s611_s24  ;;  %s564_s18 = sld [smem:[#allocation3 + $0x305]] }
  0x42   :  { %v170_v46 = vstv %s710_s20  ;;  %s566_s20 = sld [smem:[#allocation3 + $0x6]] }
  0x44   :  { %464 = vrot.lane.b32.xlu1 %v453_v15, %s611_s24  ;;  %462 = vrot.lane.b32.xlu0 %v452_v16, %s611_s24  ;;  %v117_v15 = vstv %s693_s14  ;;  %s728_s24 = sld [smem:[#allocation3 + $0x382]] }
  0x45   :  { %s560_s14 = sld [smem:[#allocation3 + $0x105]] }
  0x82   :  { %v85_v42 = vpop.permute.xlu1 %84  ;;  %v81_v43 = vpop.permute.xlu0 %80 }
  0x86   :  { %v87_v48 = vpop.permute.xlu1 %86  ;;  %v83_v49 = vpop.permute.xlu0 %82 }
  0x87   :  { %v90_v50 = vsel %vm88_vm0, %v85_v42, %v87_v48  ;;  %v89_v51 = vsel %vm88_vm0, %v81_v43, %v83_v49  ;;  %v165_v43 = vstv %s707_s19  ;;  %s565_s19 = sld [smem:[#allocation3 + $0x385]] }
  0x88   :  { %94 = vst [vmem:[#allocation2 + $0x8] sm:$0x7f] %v90_v50  ;;  %93 = vst [vmem:[#allocation2] sm:$0xff] %v89_v51  ;;  %v98_v58 = vmul.f32 %v97_v54, %v89_v51  ;;  %v175_v51 = vstv %s713_s1  ;;  %v180_v54 = vstv %s718_s21  ;;  %s567_s1 = sld [smem:[#allocation3 + $0x86]] }
  0x89   :  { %s568_s21 = sld [smem:[#allocation3 + $0x106]] }
  0x8a   :  { %v146_v55 = vpop.permute.xlu1 %145  ;;  %v144_v56 = vpop.permute.xlu0 %143  ;;  %v99_v3 = vadd.f32 %v98_v58, %v71_v57 }
  0x8b   :  { %v152_v1 = vsel %vm151_vm1, %v144_v56, %v146_v55 }
  0x8c   :  { %v161_v45 = vmul.f32 %v160_v37, %v152_v1 }
  0x8e   :  { %v150_v60 = vpop.permute.xlu1 %149  ;;  %v148_v61 = vpop.permute.xlu0 %147 }
  0x8f   :  { %v100_v63 = vld [vmem:[#allocation2 + $0x1] sm:$0xff]  ;;  %v153_v2 = vsel %vm151_vm1, %v148_v61, %v150_v60 }
  0x90   :  { %v105_v0 = vld [vmem:[#allocation2 + $0x2] sm:$0xff]  ;;  %v103_v4 = vmul.f32 %v102_v59, %v100_v63 }
  0x91   :  { %v110_v5 = vld [vmem:[#allocation2 + $0x3] sm:$0xff]  ;;  %v108_v12 = vmul.f32 %v107_v62, %v105_v0 }
  0x92   :  { %v115_v6 = vld [vmem:[#allocation2 + $0x4] sm:$0xff]  ;;  %v104_v11 = vadd.f32 %v103_v4, %v99_v3  ;;  %v209_v13 = vpop.permute.xlu1 %208  ;;  %v207_v14 = vpop.permute.xlu0 %206  ;;  %v113_v17 = vmul.f32 %v112_v7, %v110_v5  ;;  %v190_v7 = vstv %s725_s23  ;;  %s570_s23 = sld [smem:[#allocation3 + $0x206]] }
  0x93   :  { %v120_v8 = vld [vmem:[#allocation2 + $0x5] sm:$0xff]  ;;  %v118_v20 = vmul.f32 %v117_v15, %v115_v6  ;;  %v715_v28 = vsel %vm214_vm2, %v207_v14, %v209_v13  ;;  %v223_v15 = vstv %s731_s25  ;;  %s572_s25 = sld [smem:[#allocation3 + $0x306]] }
  0x94   :  { %v125_v9 = vld [vmem:[#allocation2 + $0x6] sm:$0xff]  ;;  %v109_v16 = vadd.f32 %v108_v12, %v104_v11  ;;  %v123_v25 = vmul.f32 %v122_v18, %v120_v8  ;;  %v228_v18 = vstv %s736_s26  ;;  %s573_s26 = sld [smem:[#allocation3 + $0x386]] }
  0x95   :  { %v130_v10 = vld [vmem:[#allocation2 + $0x7] sm:$0xff]  ;;  %v128_v31 = vmul.f32 %v127_v23, %v125_v9  ;;  %v224_v23 = vmul.f32 %v223_v15, %v715_v28 }
  0x96   :  { %156 = vst [vmem:[#allocation2] sm:$0xff] %v152_v1  ;;  %157 = vst [vmem:[#allocation2 + $0x8] sm:$0x7f] %v153_v2  ;;  %v114_v19 = vadd.f32 %v113_v17, %v109_v16  ;;  %v213_v21 = vpop.permute.xlu1 %212  ;;  %v211_v22 = vpop.permute.xlu0 %210  ;;  %v133_v42 = vmul.f32 %v132_v26, %v130_v10  ;;  %v185_v1 = vstv %s722_s22  ;;  %v195_v10 = vstv %s728_s24  ;;  %s569_s22 = sld [smem:[#allocation3 + $0x186]] }
  0x97   :  { %v216_v29 = vsel %vm214_vm2, %v211_v22, %v213_v21  ;;  %s571_s24 = sld [smem:[#allocation3 + $0x286]] }
  0x98   :  { %v119_v24 = vadd.f32 %v118_v20, %v114_v19 }
  0x9a   :  { %v124_v30 = vadd.f32 %v123_v25, %v119_v24  ;;  %v272_v35 = vpop.permute.xlu1 %271  ;;  %v270_v36 = vpop.permute.xlu0 %269 }
  0x9b   :  { %v733_v56 = vsel %vm277_vm3, %v270_v36, %v272_v35  ;;  %v238_v35 = vstv %s749_s28  ;;  %s575_s28 = sld [smem:[#allocation3 + $0x87]] }
  0x9c   :  { %v129_v41 = vadd.f32 %v128_v31, %v124_v30  ;;  %v233_v30 = vstv %s746_s27  ;;  %s574_s27 = sld [smem:[#allocation3 + $0x7]] }
  0x9d   :  { %v163_v27 = vld [vmem:[#allocation2 + $0x1] sm:$0xff] }
  0x9e   :  { %v168_v32 = vld [vmem:[#allocation2 + $0x2] sm:$0xff]  ;;  %v134_v44 = vadd.f32 %v133_v42, %v129_v41  ;;  %v166_v48 = vmul.f32 %v165_v43, %v163_v27  ;;  %v276_v49 = vpop.permute.xlu1 %275  ;;  %v274_v50 = vpop.permute.xlu0 %273  ;;  %v248_v43 = vstv %s755_s30  ;;  %s577_s30 = sld [smem:[#allocation3 + $0x187]] }
  0x9f   :  { %v173_v33 = vld [vmem:[#allocation2 + $0x3] sm:$0xff]  ;;  %v171_v53 = vmul.f32 %v170_v46, %v168_v32  ;;  %v279_v57 = vsel %vm277_vm3, %v274_v50, %v276_v49  ;;  %v253_v46 = vstv %s769_s4  ;;  %s578_s4 = sld [smem:[#allocation3 + $0x207]] }
  0xa0   :  { %v178_v34 = vld [vmem:[#allocation2 + $0x4] sm:$0xff]  ;;  %v162_v47 = vadd.f32 %v161_v45, %v134_v44  ;;  %v176_v59 = vmul.f32 %v175_v51, %v173_v33 }
  0xa1   :  { %v183_v38 = vld [vmem:[#allocation2 + $0x5] sm:$0xff]  ;;  %v181_v6 = vmul.f32 %v180_v54, %v178_v34 }
  0xa2   :  { %v188_v39 = vld [vmem:[#allocation2 + $0x6] sm:$0xff]  ;;  %v167_v52 = vadd.f32 %v166_v48, %v162_v47  ;;  %v335_v63 = vpop.permute.xlu1 %334  ;;  %v333_v0 = vpop.permute.xlu0 %332  ;;  %v186_v9 = vmul.f32 %v185_v1, %v183_v38  ;;  %v243_v38 = vstv %s752_s29  ;;  %s576_s29 = sld [smem:[#allocation3 + $0x107]] }
  0xa3   :  { %v193_v40 = vld [vmem:[#allocation2 + $0x7] sm:$0xff]  ;;  %v191_v12 = vmul.f32 %v190_v7, %v188_v39  ;;  %v759_v20 = vsel %vm340_vm4, %v333_v0, %v335_v63  ;;  %v286_v0 = vstv %s782_s6  ;;  %s580_s6 = sld [smem:[#allocation3 + $0x307]] }
  0xa4   :  { %219 = vst [vmem:[#allocation2] sm:$0xff] %v715_v28  ;;  %220 = vst [vmem:[#allocation2 + $0x8] sm:$0x7f] %v216_v29  ;;  %v172_v58 = vadd.f32 %v171_v53, %v167_v52  ;;  %v196_v17 = vmul.f32 %v195_v10, %v193_v40  ;;  %v287_v7 = vmul.f32 %v286_v0, %v733_v56 }
  0xa6   :  { %v177_v5 = vadd.f32 %v176_v59, %v172_v58  ;;  %v339_v13 = vpop.permute.xlu1 %338  ;;  %v337_v14 = vpop.permute.xlu0 %336  ;;  %v258_v58 = vstv %s779_s5  ;;  %s579_s5 = sld [smem:[#allocation3 + $0x287]] }
  0xa7   :  { %v342_v21 = vsel %vm340_vm4, %v337_v14, %v339_v13 }
  0xa8   :  { %v182_v8 = vadd.f32 %v181_v6, %v177_v5  ;;  %v291_v5 = vstv %s785_s7  ;;  %s581_s7 = sld [smem:[#allocation3 + $0x387]] }
  0xaa   :  { %v187_v11 = vadd.f32 %v186_v9, %v182_v8  ;;  %v398_v27 = vpop.permute.xlu1 %397  ;;  %v396_v29 = vpop.permute.xlu0 %395  ;;  %v296_v9 = vstv %s788_s8 }
  0xab   :  { %v226_v55 = vld [vmem:[#allocation2 + $0x1] sm:$0xff]  ;;  %v792_v48 = vsel %vm403_vm5, %v396_v29, %v398_v27 }
  0xac   :  { %v231_v60 = vld [vmem:[#allocation2 + $0x2] sm:$0xff]  ;;  %v192_v16 = vadd.f32 %v191_v12, %v187_v11  ;;  %v229_v34 = vmul.f32 %v228_v18, %v226_v55  ;;  %v301_v12 = vstv %s802_s0 }
  0xad   :  { %v236_v61 = vld [vmem:[#allocation2 + $0x3] sm:$0xff]  ;;  %v234_v37 = vmul.f32 %v233_v30, %v231_v60 }
  0xae   :  { %v241_v62 = vld [vmem:[#allocation2 + $0x4] sm:$0xff]  ;;  %v197_v22 = vadd.f32 %v196_v17, %v192_v16  ;;  %v239_v40 = vmul.f32 %v238_v35, %v236_v61  ;;  %v402_v41 = vpop.permute.xlu1 %401  ;;  %v400_v42 = vpop.permute.xlu0 %399 }
  0xaf   :  { %v738_v2 = vld [vmem:[#allocation2 + $0x5] sm:$0xff]  ;;  %v244_v45 = vmul.f32 %v243_v38, %v241_v62  ;;  %v405_v49 = vsel %vm403_vm5, %v400_v42, %v402_v41  ;;  %v354_v42 = vstv %s559_s13 }
  0xb0   :  { %v740_v3 = vld [vmem:[#allocation2 + $0x6] sm:$0xff]  ;;  %v225_v28 = vadd.f32 %v224_v23, %v197_v22  ;;  %v249_v51 = vmul.f32 %v248_v43, %v738_v2 }
  0xb1   :  { %v742_v4 = vld [vmem:[#allocation2 + $0x7] sm:$0xff]  ;;  %v254_v63 = vmul.f32 %v253_v46, %v740_v3  ;;  %v364_v46 = vstv %s561_s15 }
  0xb2   :  { %282 = vst [vmem:[#allocation2] sm:$0xff] %v733_v56  ;;  %283 = vst [vmem:[#allocation2 + $0x8] sm:$0x7f] %v279_v57  ;;  %v230_v36 = vadd.f32 %v229_v34, %v225_v28  ;;  %v461_v55 = vpop.permute.xlu1 %460  ;;  %v459_v57 = vpop.permute.xlu0 %458  ;;  %v259_v2 = vmul.f32 %v258_v58, %v742_v4  ;;  %v316_v34 = vstv %s821_s10  ;;  %v379_v58 = vstv %s564_s18 }
  0xb3   :  { %v829_v13 = vsel %vm466_vm6, %v459_v57, %v461_v55  ;;  %v374_v55 = vstv %s563_s17 }
  0xb4   :  { %v235_v39 = vadd.f32 %v234_v37, %v230_v36  ;;  %v321_v37 = vstv %s825_s11 }
  0xb6   :  { %v240_v44 = vadd.f32 %v239_v40, %v235_v39  ;;  %v465_v8 = vpop.permute.xlu1 %464  ;;  %v463_v3 = vpop.permute.xlu0 %462  ;;  %v349_v40 = vstv %s558_s12 }
  0xb7   :  { %v468_v14 = vsel %vm466_vm6, %v463_v3, %v465_v8  ;;  %v427_v3 = vstv %s569_s22 }
  0xb8   :  { %v245_v50 = vadd.f32 %v244_v45, %v240_v44  ;;  %v359_v44 = vstv %s560_s14 }
  0xb9   :  { %v757_v19 = vld [vmem:[#allocation2 + $0x1] sm:$0xff] }
  0xba   :  { %v762_v24 = vld [vmem:[#allocation2 + $0x2] sm:$0xff]  ;;  %v250_v62 = vadd.f32 %v249_v51, %v245_v50  ;;  %v292_v11 = vmul.f32 %v291_v5, %v757_v19  ;;  %v306_v19 = vstv %s813_s9  ;;  %v369_v50 = vstv %s562_s16 }
  0xbb   :  { %v764_v25 = vld [vmem:[#allocation2 + $0x3] sm:$0xff]  ;;  %v297_v15 = vmul.f32 %v296_v9, %v762_v24  ;;  %v311_v24 = vstv %s817_s2  ;;  %v417_v5 = vstv %s567_s1 }
  0xbc   :  { %v766_v26 = vld [vmem:[#allocation2 + $0x4] sm:$0xff]  ;;  %v255_v1 = vadd.f32 %v254_v63, %v250_v62  ;;  %v302_v29 = vmul.f32 %v301_v12, %v764_v25  ;;  %v384_v63 = vstv %s565_s19  ;;  %v437_v12 = vstv %s571_s24 }
  0xbd   :  { %v771_v31 = vld [vmem:[#allocation2 + $0x5] sm:$0xff]  ;;  %v307_v28 = vmul.f32 %v306_v19, %v766_v26  ;;  %v350_v26 = vmul.f32 %v349_v40, %v759_v20  ;;  %v447_v19 = vstv %s573_s26 }
  0xbe   :  { %v773_v32 = vld [vmem:[#allocation2 + $0x6] sm:$0xff]  ;;  %v260_v6 = vadd.f32 %v259_v2, %v255_v1  ;;  %v312_v36 = vmul.f32 %v311_v24, %v771_v31  ;;  %v412_v1 = vstv %s566_s20 }
  0xbf   :  { %v775_v33 = vld [vmem:[#allocation2 + $0x7] sm:$0xff]  ;;  %v317_v39 = vmul.f32 %v316_v34, %v773_v32 }
  0xc0   :  { %345 = vst [vmem:[#allocation2] sm:$0xff] %v759_v20  ;;  %346 = vst [vmem:[#allocation2 + $0x8] sm:$0x7f] %v342_v21  ;;  %v288_v10 = vadd.f32 %v287_v7, %v260_v6  ;;  %v322_v41 = vmul.f32 %v321_v37, %v775_v33  ;;  %v422_v7 = vstv %s568_s21 }
  0xc2   :  { %v293_v56 = vadd.f32 %v292_v11, %v288_v10  ;;  %v432_v10 = vstv %s570_s23 }
  0xc4   :  { %v298_v27 = vadd.f32 %v297_v15, %v293_v56  ;;  %v442_v56 = vstv %s572_s25 }
  0xc6   :  { %v303_v30 = vadd.f32 %v302_v29, %v298_v27  ;;  %v475_v29 = vstv %s574_s27 }
  0xc7   :  { %v790_v47 = vld [vmem:[#allocation2 + $0x1] sm:$0xff] }
  0xc8   :  { %v795_v52 = vld [vmem:[#allocation2 + $0x2] sm:$0xff]  ;;  %v308_v35 = vadd.f32 %v307_v28, %v303_v30  ;;  %v355_v31 = vmul.f32 %v354_v42, %v790_v47  ;;  %v480_v30 = vstv %s575_s28 }
  0xc9   :  { %v797_v53 = vld [vmem:[#allocation2 + $0x3] sm:$0xff]  ;;  %v360_v32 = vmul.f32 %v359_v44, %v795_v52 }
  0xca   :  { %v799_v54 = vld [vmem:[#allocation2 + $0x4] sm:$0xff]  ;;  %v313_v38 = vadd.f32 %v312_v36, %v308_v35  ;;  %v365_v33 = vmul.f32 %v364_v46, %v797_v53  ;;  %v485_v35 = vstv %s576_s29 }
  0xcb   :  { %v804_v59 = vld [vmem:[#allocation2 + $0x5] sm:$0xff]  ;;  %v370_v20 = vmul.f32 %v369_v50, %v799_v54  ;;  %v413_v54 = vmul.f32 %v412_v1, %v792_v48 }
  0xcc   :  { %v806_v60 = vld [vmem:[#allocation2 + $0x6] sm:$0xff]  ;;  %v318_v25 = vadd.f32 %v317_v39, %v313_v38  ;;  %v375_v47 = vmul.f32 %v374_v55, %v804_v59  ;;  %v490_v38 = vstv %s577_s30 }
  0xcd   :  { %v808_v61 = vld [vmem:[#allocation2 + $0x7] sm:$0xff]  ;;  %v380_v52 = vmul.f32 %v379_v58, %v806_v60 }
  0xce   :  { %408 = vst [vmem:[#allocation2] sm:$0xff] %v792_v48  ;;  %409 = vst [vmem:[#allocation2 + $0x8] sm:$0x7f] %v405_v49  ;;  %v323_v43 = vadd.f32 %v322_v41, %v318_v25  ;;  %v385_v53 = vmul.f32 %v384_v63, %v808_v61  ;;  %v495_v25 = vstv %s578_s4 }
  0xd0   :  { %v351_v45 = vadd.f32 %v350_v26, %v323_v43  ;;  %v500_v43 = vstv %s579_s5 }
  0xd2   :  { %v356_v49 = vadd.f32 %v355_v31, %v351_v45  ;;  %v505_v31 = vstv %s580_s6 }
  0xd4   :  { %v361_v51 = vadd.f32 %v360_v32, %v356_v49  ;;  %v510_v32 = vstv %s581_s7 }
  0xd5   :  { %v827_v4 = vld [vmem:[#allocation2 + $0x1] sm:$0xff] }
  0xd6   :  { %v832_v16 = vld [vmem:[#allocation2 + $0x2] sm:$0xff]  ;;  %v366_v57 = vadd.f32 %v365_v33, %v361_v51  ;;  %v418_v59 = vmul.f32 %v417_v5, %v827_v4 }
  0xd7   :  { %v834_v17 = vld [vmem:[#allocation2 + $0x3] sm:$0xff]  ;;  %v423_v60 = vmul.f32 %v422_v7, %v832_v16 }
  0xd8   :  { %v836_v18 = vld [vmem:[#allocation2 + $0x4] sm:$0xff]  ;;  %v371_v62 = vadd.f32 %v370_v20, %v366_v57  ;;  %v428_v61 = vmul.f32 %v427_v3, %v834_v17 }
  0xd9   :  { %v839_v21 = vld [vmem:[#allocation2 + $0x5] sm:$0xff]  ;;  %v433_v48 = vmul.f32 %v432_v10, %v836_v18  ;;  %v476_v18 = vmul.f32 %v475_v29, %v829_v13 }
  0xda   :  { %v841_v22 = vld [vmem:[#allocation2 + $0x6] sm:$0xff]  ;;  %v376_v0 = vadd.f32 %v375_v47, %v371_v62  ;;  %v438_v4 = vmul.f32 %v437_v12, %v839_v21 }
  0xdb   :  { %v843_v23 = vld [vmem:[#allocation2 + $0x7] sm:$0xff]  ;;  %v443_v16 = vmul.f32 %v442_v56, %v841_v22 }
  0xdc   :  { %471 = vst [vmem:[#allocation2] sm:$0xff] %v829_v13  ;;  %472 = vst [vmem:[#allocation2 + $0x8] sm:$0x7f] %v468_v14  ;;  %v381_v2 = vadd.f32 %v380_v52, %v376_v0  ;;  %v448_v17 = vmul.f32 %v447_v19, %v843_v23 }
  0xde   :  { %v386_v6 = vadd.f32 %v385_v53, %v381_v2 }
  0xe0   :  { %v414_v8 = vadd.f32 %v413_v54, %v386_v6 }
  0xe2   :  { %v419_v9 = vadd.f32 %v418_v59, %v414_v8 }
  0xe3   :  { %v478_v28 = vld [vmem:[#allocation2 + $0x1] sm:$0xff] }
  0xe4   :  { %v424_v11 = vadd.f32 %v423_v60, %v419_v9  ;;  %v483_v36 = vld [vmem:[#allocation2 + $0x2] sm:$0xff]  ;;  %v481_v37 = vmul.f32 %v480_v30, %v478_v28 }
  0xe5   :  { %v488_v39 = vld [vmem:[#allocation2 + $0x3] sm:$0xff]  ;;  %v486_v40 = vmul.f32 %v485_v35, %v483_v36 }
  0xe6   :  { %v429_v14 = vadd.f32 %v428_v61, %v424_v11  ;;  %v493_v41 = vld [vmem:[#allocation2 + $0x4] sm:$0xff]  ;;  %v491_v23 = vmul.f32 %v490_v38, %v488_v39 }
  0xe7   :  { %v498_v26 = vld [vmem:[#allocation2 + $0x5] sm:$0xff]  ;;  %v496_v45 = vmul.f32 %v495_v25, %v493_v41 }
  0xe8   :  { %v434_v15 = vadd.f32 %v433_v48, %v429_v14  ;;  %v503_v13 = vld [vmem:[#allocation2 + $0x6] sm:$0xff]  ;;  %v501_v49 = vmul.f32 %v500_v43, %v498_v26 }
  0xe9   :  { %v508_v50 = vld [vmem:[#allocation2 + $0x7] sm:$0xff]  ;;  %v506_v33 = vmul.f32 %v505_v31, %v503_v13 }
  0xea   :  { %v439_v27 = vadd.f32 %v438_v4, %v434_v15  ;;  %v511_v57 = vmul.f32 %v510_v32, %v508_v50 }
  0xec   :  { %v444_v24 = vadd.f32 %v443_v16, %v439_v27 }
  0xee   :  { %v449_v34 = vadd.f32 %v448_v17, %v444_v24 }
  0xf0   :  { %v477_v21 = vadd.f32 %v476_v18, %v449_v34 }
  0xf2   :  { %v482_v22 = vadd.f32 %v481_v37, %v477_v21 }
  0xf4   :  { %v487_v42 = vadd.f32 %v486_v40, %v482_v22 }
  0xf6   :  { %v492_v44 = vadd.f32 %v491_v23, %v487_v42 }
  0xf8   :  { %v497_v46 = vadd.f32 %v496_v45, %v492_v44 }
  0xfa   :  { %v502_v51 = vadd.f32 %v501_v49, %v497_v46 }
  0xfc   :  { %v507_v55 = vadd.f32 %v506_v33, %v502_v51 }
  0xfe   :  { %v512_v20 = vadd.f32 %v511_v57, %v507_v55 }
 0x100   :  { %513 = vst [vmem:[%s877_s3] sm:$0xff] %v512_v20 }
 0x101   :  { %518 = vsyncpa [#allocation4], 1 }

</bundles_post_ra>
